<compile_context>
chip_gen: v7x
topology: tpu7x:2x2x1
jax: 0.10.0
libtpu: 0.0.40
codegen_flags: <defaults>
</compile_context>

<pallas_src>
import functools

import jax
import jax.numpy as jnp
from jax import lax
from jax.experimental import pallas as pl
from jax.experimental.pallas import tpu as pltpu

_EPS = 1e-6  # PyTorch F.pairwise_distance default eps (added to the difference)
_GRAN = 8    # sublane granularity for the batch (second-to-last) block dim


def _contrastive_partial_kernel(o1_ref, o2_ref, lab_ref, out_ref, *, margin, batch):
    # o1_ref/o2_ref: (TB, D) native dtype; lab_ref: (TB, 1) f32
    # out_ref: (1, 8, 128) f32 -- the tile's partial loss sum, broadcast (lane-dense store)
    i = pl.program_id(0)
    tb = o1_ref.shape[0]

    o1 = o1_ref[...].astype(jnp.float32)
    o2 = o2_ref[...].astype(jnp.float32)
    diff = o1 - o2 + _EPS                                      # (TB, D)  VPU

    # Mask ragged-tail rows (row >= batch): their VMEM contents are unspecified, so
    # zero the diff BEFORE the reduce (avoids NaN/Inf creeping into sq_dist).
    row_ids = i * tb + lax.broadcasted_iota(jnp.int32, (tb, 1), 0)
    valid = row_ids < batch                                    # (TB, 1) bool
    diff = jnp.where(valid, diff, 0.0)

    sq_dist = jnp.sum(diff * diff, axis=-1, keepdims=True)     # (TB, 1)  XLU reduce
    dist = jnp.sqrt(sq_dist)                                   # (TB, 1)  EUP  == d
    lab = lab_ref[...]                                         # (TB, 1)  f32

    pos = dist * dist                                          # matches torch.pow(d, 2)
    neg = jnp.maximum(margin - dist, 0.0)
    row_loss = pos * lab + neg * neg * (1.0 - lab)             # per-row contrastive loss
    row_loss = jnp.where(valid, row_loss, 0.0)                 # drop padded rows

    out_ref[...] = jnp.broadcast_to(jnp.sum(row_loss), out_ref.shape).astype(jnp.float32)


def _vmem_capacity_bytes():
    try:
        info = pltpu.get_tpu_info()
        for attr in ("vmem_capacity_bytes", "vmem_bytes", "vmem_size_bytes"):
            v = getattr(info, attr, None)
            if v:
                return int(v)
    except Exception:
        pass
    return 64 * 1024 * 1024  # conservative: v7x per-TensorCore physical VMEM


def _plan(B, D, itemsize, vmem_cap, block_rows=None):
    """Pick the batch tile (TB) and a derived vmem_limit_bytes."""
    # Per-row cost: 2 inputs x 2 pipeline buffers (native dtype) + f32 upcast/diff
    # temporaries + tiny label/loss columns.
    per_row_native = 2 * D * itemsize
    per_row_vmem = 2 * 2 * D * itemsize + 3 * D * 4 + 4 * 4

    if block_rows is not None:
        tb = max(_GRAN, (int(block_rows) // _GRAN) * _GRAN)
    else:
        target_step_bytes = 4 * 1024 * 1024                  # ~4 MiB of inputs per step
        tb_target = target_step_bytes // max(per_row_native, 1)
        vmem_budget = int(0.45 * vmem_cap)                   # generation-aware working set
        tb_vmem = vmem_budget // max(per_row_vmem, 1)
        tb = min(tb_target, tb_vmem, 4096)
        tb = max(_GRAN, (tb // _GRAN) * _GRAN)
        if B >= 1024:                                        # keep >= 2 tiles for 2x TC (v7x)
            tb = min(tb, max(_GRAN, ((B // 2) // _GRAN) * _GRAN))

    # Clamp so the block never exceeds the array rows (ragged tail is masked in-kernel).
    if B <= _GRAN:
        tb = B                                               # full-dim escape
    else:
        tb = max(_GRAN, min(tb, (B // _GRAN) * _GRAN))

    est = tb * per_row_vmem + 4 * 8 * 128 * 4
    vmem_limit = int(min(0.92 * vmem_cap, max(16 * 1024 * 1024, 2 * est + (4 << 20))))
    return int(tb), int(vmem_limit)


def contrastive_loss(output1, output2, label, margin=2.0, block_rows=None):
    assert output1.shape == output2.shape and output1.ndim == 2
    B, D = output1.shape
    itemsize = jnp.dtype(output1.dtype).itemsize
    vmem_cap = _vmem_capacity_bytes()
    TB, vmem_limit = _plan(B, D, itemsize, vmem_cap, block_rows)
    num_tiles = pl.cdiv(B, TB)

    lab2d = label.astype(jnp.float32).reshape(B, 1)

    kernel = functools.partial(
        _contrastive_partial_kernel, margin=float(margin), batch=int(B)
    )

    partials = pl.pallas_call(
        kernel,
        out_shape=jax.ShapeDtypeStruct((num_tiles, 8, 128), jnp.float32),
        grid_spec=pltpu.PrefetchScalarGridSpec(
            num_scalar_prefetch=0,
            grid=(num_tiles,),
            in_specs=[
                pl.BlockSpec((TB, D), lambda i: (i, 0)),
                pl.BlockSpec((TB, D), lambda i: (i, 0)),
                pl.BlockSpec((TB, 1), lambda i: (i, 0)),
            ],
            out_specs=pl.BlockSpec((1, 8, 128), lambda i: (i, 0, 0)),
        ),
        compiler_params=pltpu.CompilerParams(
            dimension_semantics=("parallel",),   # tiles independent -> both v7x TCs usable
            vmem_limit_bytes=vmem_limit,
        ),
    )(output1, output2, lab2d)

    # Tiny finish: sum num_tiles partial sums, divide by the true batch size.
    return jnp.sum(partials[:, 0, 0]) / jnp.float32(B)


def _reference(output1, output2, label, margin=2.0):
    o1 = output1.astype(jnp.float32)
    o2 = output2.astype(jnp.float32)
    diff = o1 - o2 + _EPS
    d = jnp.sqrt(jnp.sum(diff * diff, axis=-1))
    lab = label.astype(jnp.float32)
    return jnp.mean(d * d * lab + jnp.maximum(margin - d, 0.0) ** 2 * (1.0 - lab))


if __name__ == "__main__":
    key = jax.random.PRNGKey(0)
    ks = jax.random.split(key, 9)

    # Case 1: small siamese embedding batch, f32, single tile.
    B, D = 8, 32
    o1 = jax.random.normal(ks[0], (B, D), dtype=jnp.float32)
    o2 = jax.random.normal(ks[1], (B, D), dtype=jnp.float32)
    lab = jax.random.bernoulli(ks[2], 0.5, (B,)).astype(jnp.float32)
    loss = contrastive_loss(o1, o2, lab)
    jax.block_until_ready(loss)
    ref = _reference(o1, o2, lab)
    assert jnp.allclose(loss, ref, rtol=1e-5, atol=1e-5), (loss, ref)

    # Case 2: ragged batch (B % TB != 0), bf16 inputs, auto tiling
    # (exercises native-dtype DMA + in-kernel tail masking, no HBM pad copy).
    B2, D2 = 50, 40
    o1b = jax.random.normal(ks[3], (B2, D2), dtype=jnp.float32).astype(jnp.bfloat16)
    o2b = jax.random.normal(ks[4], (B2, D2), dtype=jnp.float32).astype(jnp.bfloat16)
    labb = jax.random.bernoulli(ks[5], 0.5, (B2,)).astype(jnp.float32)
    loss2 = contrastive_loss(o1b, o2b, labb)
    jax.block_until_ready(loss2)
    ref2 = _reference(o1b, o2b, labb)
    assert jnp.allclose(loss2, ref2, rtol=1e-4, atol=1e-4), (loss2, ref2)

    # Case 3: forced small tiles -> multi-tile grid with a masked ragged tail,
    # non-128 feature width, non-default margin.
    B3, D3 = 37, 130
    o1c = jax.random.normal(ks[6], (B3, D3), dtype=jnp.float32)
    o2c = jax.random.normal(ks[7], (B3, D3), dtype=jnp.float32)
    labc = jax.random.bernoulli(ks[8], 0.5, (B3,)).astype(jnp.float32)
    loss3 = contrastive_loss(o1c, o2c, labc, margin=1.5, block_rows=16)
    jax.block_until_ready(loss3)
    ref3 = _reference(o1c, o2c, labc, margin=1.5)
    assert jnp.allclose(loss3, ref3, rtol=1e-5, atol=1e-5), (loss3, ref3)

    print("KERNEL_OK")
</pallas_src>

<mosaic_0001>
module attributes {stable_mosaic.version = 11 : i64} {
  func.func @_contrastive_partial_kernel(%arg0: i32, %arg1: memref<8x32xf32, #tpu.memory_space<vmem>>, %arg2: memref<8x32xf32, #tpu.memory_space<vmem>>, %arg3: memref<8x1xf32, #tpu.memory_space<vmem>>, %arg4: memref<1x8x128xf32, #tpu.memory_space<vmem>>) attributes {dimension_semantics = [#tpu.dimension_semantics<parallel>], iteration_bounds = array<i64: 1>, scalar_prefetch = 0 : i64, scratch_operands = 0 : i64, tpu.core_type = #tpu.core_type<tc>, window_params = [{transform_indices = @transform_0, window_bounds = array<i64: 8, 32>}, {transform_indices = @transform_1, window_bounds = array<i64: 8, 32>}, {transform_indices = @transform_2, window_bounds = array<i64: 8, 1>}, {transform_indices = @transform_3, window_bounds = array<i64: 1, 8, 128>}]} {
    %c0 = arith.constant 0 : index
    %c0_0 = arith.constant 0 : index
    %0 = vector.load %arg1[%c0, %c0_0] : memref<8x32xf32, #tpu.memory_space<vmem>>, vector<8x32xf32>
    %c0_1 = arith.constant 0 : index
    %c0_2 = arith.constant 0 : index
    %1 = vector.load %arg2[%c0_1, %c0_2] : memref<8x32xf32, #tpu.memory_space<vmem>>, vector<8x32xf32>
    %2 = arith.subf %0, %1 : vector<8x32xf32>
    %cst = arith.constant 9.99999997E-7 : f32
    %3 = vector.broadcast %cst : f32 to vector<8x32xf32>
    %4 = arith.addf %2, %3 : vector<8x32xf32>
    %c8_i32 = arith.constant 8 : i32
    %5 = arith.muli %arg0, %c8_i32 : i32
    %6 = tpu.iota {dimensions = array<i32: 0>} : vector<8x1xi32>
    %7 = vector.broadcast %5 : i32 to vector<8x1xi32>
    %8 = arith.addi %7, %6 : vector<8x1xi32>
    %c8_i32_3 = arith.constant 8 : i32
    %9 = vector.broadcast %c8_i32_3 : i32 to vector<8x1xi32>
    %10 = arith.cmpi slt, %8, %9 : vector<8x1xi32>
    %cst_4 = arith.constant 0.000000e+00 : f32
    %11 = vector.shape_cast %10 : vector<8x1xi1> to vector<8x1xi1>
    %12 = vector.broadcast %11 : vector<8x1xi1> to vector<8x32xi1>
    %13 = vector.broadcast %cst_4 : f32 to vector<8x32xf32>
    %14 = arith.select %12, %4, %13 : vector<8x32xi1>, vector<8x32xf32>
    %15 = arith.mulf %14, %14 : vector<8x32xf32>
    %cst_5 = arith.constant dense<0.000000e+00> : vector<8xf32>
    %16 = vector.multi_reduction <add>, %15, %cst_5 [1] : vector<8x32xf32> to vector<8xf32>
    %17 = vector.shape_cast %16 : vector<8xf32> to vector<8x1xf32>
    %18 = math.sqrt %17 : vector<8x1xf32>
    %c0_6 = arith.constant 0 : index
    %c0_7 = arith.constant 0 : index
    %19 = vector.load %arg3[%c0_6, %c0_7] : memref<8x1xf32, #tpu.memory_space<vmem>>, vector<8x1xf32>
    %20 = arith.mulf %18, %18 : vector<8x1xf32>
    %cst_8 = arith.constant 2.000000e+00 : f32
    %21 = vector.broadcast %cst_8 : f32 to vector<8x1xf32>
    %22 = arith.subf %21, %18 : vector<8x1xf32>
    %cst_9 = arith.constant 0.000000e+00 : f32
    %23 = vector.broadcast %cst_9 : f32 to vector<8x1xf32>
    %24 = arith.maximumf %22, %23 : vector<8x1xf32>
    %25 = arith.mulf %20, %19 : vector<8x1xf32>
    %26 = arith.mulf %24, %24 : vector<8x1xf32>
    %cst_10 = arith.constant 1.000000e+00 : f32
    %27 = vector.broadcast %cst_10 : f32 to vector<8x1xf32>
    %28 = arith.subf %27, %19 : vector<8x1xf32>
    %29 = arith.mulf %26, %28 : vector<8x1xf32>
    %30 = arith.addf %25, %29 : vector<8x1xf32>
    %cst_11 = arith.constant 0.000000e+00 : f32
    %31 = vector.broadcast %cst_11 : f32 to vector<8x1xf32>
    %32 = arith.select %10, %30, %31 : vector<8x1xi1>, vector<8x1xf32>
    %33 = vector.shape_cast %32 : vector<8x1xf32> to vector<1x8x1xf32>
    %cst_12 = arith.constant dense<0.000000e+00> : vector<1xf32>
    %34 = vector.multi_reduction <add>, %33, %cst_12 [1, 2] : vector<1x8x1xf32> to vector<1xf32>
    %35 = vector.shape_cast %34 : vector<1xf32> to vector<1x1x1xf32>
    %36 = vector.extract %35[0, 0, 0] : f32 from vector<1x1x1xf32>
    %37 = vector.broadcast %36 : f32 to vector<1x8x128xf32>
    %c0_13 = arith.constant 0 : index
    %c0_14 = arith.constant 0 : index
    %c0_15 = arith.constant 0 : index
    %38 = vector.load %arg4[%c0_13, %c0_14, %c0_15] : memref<1x8x128xf32, #tpu.memory_space<vmem>>, vector<1x8x128xf32>
    tpu.vector_store %arg4[%c0_13, %c0_14, %c0_15], %37 {strides = array<i32>} : memref<1x8x128xf32, #tpu.memory_space<vmem>>, vector<1x8x128xf32>,
    return
  }
  func.func @transform_0(%arg0: i32) -> (i32, i32) {
    %c0_i32 = arith.constant 0 : i32
    %c0_i32_0 = arith.constant 0 : i32
    return %arg0, %c0_i32 : i32, i32
  }
  func.func @transform_1(%arg0: i32) -> (i32, i32) {
    %c0_i32 = arith.constant 0 : i32
    %c0_i32_0 = arith.constant 0 : i32
    return %arg0, %c0_i32 : i32, i32
  }
  func.func @transform_2(%arg0: i32) -> (i32, i32) {
    %c0_i32 = arith.constant 0 : i32
    %c0_i32_0 = arith.constant 0 : i32
    return %arg0, %c0_i32 : i32, i32
  }
  func.func @transform_3(%arg0: i32) -> (i32, i32, i32) {
    %c0_i32 = arith.constant 0 : i32
    %c0_i32_0 = arith.constant 0 : i32
    %c0_i32_1 = arith.constant 0 : i32
    return %arg0, %c0_i32, %c0_i32_0 : i32, i32, i32
  }
}

</mosaic_0001>

<bundles_post_ra>
// kernel: tpu_custom_call.1
= control target key start
LH: loop header
LB: loop body
LE: loop exit
PB: predicated region body
PF: predicated region fallthrough
CT: control target
= control target key end

     0   :  { %8 = vsyncpa [#allocation3], 0  ;;  %s196_s0 = inlined_call_operand.vmem [shape: f32[8,32], index: 0, kind: input, shape index: {}]   ;;  %s197_s1 = inlined_call_operand.hbm [shape: f32[8,32], index: 1, kind: input, shape index: {}]   ;;  %s198_s2 = inlined_call_operand.vmem [shape: f32[8,1], index: 2, kind: input, shape index: {}]   ;;  %s199_s3 = inlined_call_operand.hbm [shape: f32[1,8,128], index: 3, kind: output, shape index: {}]  }
   0x1   :  { %9 = vsyncpa [#allocation4], 0  ;;  %s144_s12 = smov [#allocation2]   ;;  %s96_s16 = scalar_lea.hbm %s197_s1, 128 }
   0x2   :  { %s18_s13 = sshll.u32 %s144_s12, 4  ;;  %p97_p0 = scmp.ne.s32.totalorder %s197_s1, %s96_s16  ;;  %s19_s13 = int_to_ptr.vmem [resolvable:$true] %s18_s13 }
   0x3   :  { %p100_p1 = scmp.lt.u32.totalorder %s96_s16, %s197_s1 }
   0x5   :  { %p102_p2 = pnand %p100_p1, %p97_p0 }
   0x7   :  { %105 = shalt.err (!%p102_p2)
}
   0x8   :  { %s106_s21 = scalar_lea.vmem %s19_s13, 128  ;;  %p111_p4 = scmp.lt.s32.totalorder %s19_s13, %s19_s13 }
   0x9   :  { %p107_p3 = scmp.ne.s32.totalorder %s19_s13, %s106_s21  ;;  %p112_p5 = scmp.lt.s32.totalorder %s106_s21, %s106_s21 }
   0xb   :  { %p113_p6 = por %p112_p5, %p111_p4 }
   0xd   :  { %p114_p7 = pnand %p113_p6, %p107_p3 }
   0xf   :  { %117 = shalt.err (!%p114_p7)
}
  0x10   :  { %21 = dma.hbm_to_vmem [thread:$0]  %s197_s1, 128, %s19_s13, [#allocation3]  }
  0x11   :  { %140 = dma.done.wait [#allocation3], 128  }
  0x12   :  { %141 = vsyncadd [#allocation3], 4294967168  ;;  %v27_v0 = vld [vmem:[%s196_s0] sm:$0xff]  ;;  %vm41_vm0 = vcmask 261120   ;;  %vm62_vm3 = vcmask 7168   ;;  %s145_s0 = smov [#allocation5]  }
  0x13   :  { %v28_v1 = vld [vmem:[#allocation2] sm:$0xff] }
  0x14   :  { %v29_v2 = vsub.f32 %v27_v0, %v28_v1  ;;  %v52_v13 = vld [vmem:[%s198_s2] sm:$0xff]  ;;  %s81_s2 = sshll.u32 %s145_s0, 4  ;;  %s82_s2 = int_to_ptr.vmem [resolvable:$true] %s81_s2 }
  0x15   :  { %v58_v16 = vsub.f32 1.0, %v52_v13  ;;  %s118_s28 = scalar_lea.vmem %s82_s2, 128  ;;  %p123_p9 = scmp.lt.s32.totalorder %s82_s2, %s82_s2 }
  0x16   :  { %v30_v3 = vadd.f32 1e-06, %v29_v2  ;;  %p119_p8 = scmp.ne.s32.totalorder %s82_s2, %s118_s28  ;;  %p124_p10 = scmp.lt.s32.totalorder %s118_s28, %s118_s28 }
  0x18   :  { %v40_v4 = vmul.f32 %v30_v3, %v30_v3  ;;  %p125_p11 = por %p124_p10, %p123_p9 }
  0x1a   :  { %v42_v5 = vsel %vm41_vm0, %v40_v4, 0.0  ;;  %p126_p12 = pnand %p125_p11, %p119_p8 }
  0x1b   :  { %43 = vadd.xlane.f32.xlu0 %v42_v5 }
  0xa8   :  { %v44_v6 = vpop.xlane.xlu0 %43 }
  0xa9   :  { %94 = vrsqrt.f32 %v44_v6  ;;  %vm47_vm1 = vcmp.eq.f32.partialorder %v44_v6, inf  ;;  %v50_v9 = vand.u32 2147483648, %v44_v6  ;;  %vm49_vm2 = vcmp.eq.f32.partialorder %v44_v6, 0.0 }
  0xb3   :  { %v95_v7 = vpop.eup %94 }
  0xb4   :  { %v46_v8 = vmul.f32 %v95_v7, %v44_v6 }
  0xb6   :  { %v48_v10 = vsel %vm47_vm1, %v44_v6, %v46_v8 }
  0xb7   :  { %v51_v11 = vsel %vm49_vm2, %v50_v9, %v48_v10 }
  0xb8   :  { %v54_v12 = vsub.f32 2.0, %v51_v11  ;;  %v53_v14 = vmul.f32 %v51_v11, %v51_v11 }
  0xba   :  { %v55_v15 = vmax.f32 %v54_v12, 0.0  ;;  %v56_v18 = vmul.f32 %v53_v14, %v52_v13 }
  0xbc   :  { %v57_v17 = vmul.f32 %v55_v15, %v55_v15 }
  0xbe   :  { %v59_v19 = vmul.f32 %v58_v16, %v57_v17 }
  0xc0   :  { %v60_v20 = vadd.f32 %v59_v19, %v56_v18 }
  0xc2   :  { %v63_v21 = vsel %vm62_vm3, %v60_v20, 0.0 }
  0xc3   :  { %64 = vadd.xlane.f32.xlu0 %v63_v21 }
 0x150   :  { %v65_v22 = vpop.xlane.xlu0 %64 }
 0x151   :  { %v66_v23 = vrot.slane %v65_v22, 4 }
 0x153   :  { %v67_v24 = vadd.f32 %v66_v23, %v65_v22 }
 0x155   :  { %v68_v25 = vrot.slane %v67_v24, 2 }
 0x157   :  { %v69_v26 = vadd.f32 %v68_v25, %v67_v24 }
 0x159   :  { %v70_v27 = vrot.slane %v69_v26, 1 }
 0x15b   :  { %v71_v28 = vadd.f32 %v70_v27, %v69_v26 }
 0x15d   :  { %90 = vpush %v71_v28 }
 0x18e   :  { %s91_s27 = spop %90 }
 0x18f   :  { %v73_v29 = vstv %s91_s27 }
 0x190   :  { %74 = vst [vmem:[#allocation5] sm:$0xff] %v73_v29 }
 0x191   :  { %129 = shalt.err (!%p126_p12)
}
 0x192   :  { %s130_s4 = scalar_lea.hbm %s199_s3, 128 }
 0x193   :  { %p131_p13 = scmp.ne.s32.totalorder %s199_s3, %s130_s4  ;;  %p134_p0 = scmp.lt.u32.totalorder %s130_s4, %s199_s3 }
 0x195   :  { %p136_p1 = pnand %p134_p0, %p131_p13 }
 0x197   :  { %139 = shalt.err (!%p136_p1)
}
 0x198   :  { %84 = dma.vmem_to_hbm [thread:$0]  %s82_s2, 128, %s199_s3, [#allocation4]  }
 0x199   :  { %142 = dma.done.wait [#allocation4], 128  }
 0x19a   :  { %143 = vsyncadd [#allocation4], 4294967168 }
 0x19b   :  { %88 = vsyncpa [#allocation3], 1 }
 0x19c   :  { %89 = vsyncpa [#allocation4], 1 }

</bundles_post_ra>
